<compile_context>
chip_gen: v6e
topology: v6e:2x2x1
jax: 0.10.0
libtpu: 0.0.40
codegen_flags: <defaults>
</compile_context>

<pallas_src>
import functools

import numpy as np
import jax
import jax.numpy as jnp
from jax import lax
from jax.experimental import pallas as pl
from jax.experimental.pallas import tpu as pltpu


# ----------------------------------------------------------------------------
# Fused conv-as-matmul Pallas kernel:  o = act(W @ P + b) * gain [+ residual]
# ----------------------------------------------------------------------------
def _fused_conv_kernel(*refs, leaky: bool, gain: float, has_residual: bool):
    if has_residual:
        p_ref, w_ref, b_ref, r_ref, o_ref = refs
    else:
        p_ref, w_ref, b_ref, o_ref = refs
        r_ref = None

    # [Cout, K] @ [K, TN] -> [Cout, TN], f32 accumulation on the MXU.
    acc = jnp.dot(w_ref[...], p_ref[...], preferred_element_type=jnp.float32)
    acc = acc + b_ref[...]                                  # bias: [Cout, 1] broadcast
    if leaky:
        acc = jnp.where(acc >= 0.0, acc, 0.2 * acc)         # leaky_relu(0.2)
    if gain != 1.0:
        acc = acc * gain
    if has_residual:
        acc = acc + r_ref[...]                              # fused skip-branch add
    o_ref[...] = acc.astype(o_ref.dtype)


def _round_up(x, m):
    return ((x + m - 1) // m) * m


def _im2col(x, kh, kw, stride, pad):
    """NCHW -> lane-dense patch matrix [Cin*kh*kw, N*Ho*Wo] (layout plumbing only)."""
    n, c, h, w = x.shape
    ho = (h + 2 * pad - kh) // stride + 1
    wo = (w + 2 * pad - kw) // stride + 1
    xp = jnp.pad(x, ((0, 0), (0, 0), (pad, pad), (pad, pad))) if pad else x
    taps = []
    for ky in range(kh):
        for kx in range(kw):
            taps.append(xp[:, :,
                           ky:ky + stride * (ho - 1) + 1:stride,
                           kx:kx + stride * (wo - 1) + 1:stride])
    p = jnp.stack(taps, axis=2)                              # [N, Cin, kh*kw, Ho, Wo]
    p = p.transpose(1, 2, 0, 3, 4).reshape(c * kh * kw, n * ho * wo)
    return p, ho, wo


def conv_bias_act(x, w, b, *, stride, pad, leaky, gain, residual=None, lane_tile=256):
    """out = act(conv2d(x, w, stride, pad) + b) * gain [+ residual]   (NCHW in / out)."""
    n, cin, h, _ = x.shape
    cout, cin2, kh, kw = w.shape
    assert cin == cin2, "channel mismatch"
    assert (h + 2 * pad - kh) % stride == 0, "shape not divisible by stride"

    p, ho, wo = _im2col(x.astype(jnp.float32), kh, kw, stride, pad)
    kdim, nmat = p.shape
    wm = w.reshape(cout, kdim).astype(jnp.float32)
    bm = (jnp.zeros((cout,), jnp.float32) if b is None
          else b.astype(jnp.float32)).reshape(cout, 1)

    # Lane-dense tiling of the batch*spatial axis (multiple of 128 lanes).
    tn = min(lane_tile, _round_up(nmat, 128))
    npad = _round_up(nmat, tn)
    if npad != nmat:
        p = jnp.pad(p, ((0, 0), (0, npad - nmat)))

    inputs = [p, wm, bm]
    in_specs = [
        pl.BlockSpec((kdim, tn), lambda j: (0, j)),     # activations: tiled, pipelined
        pl.BlockSpec((cout, kdim), lambda j: (0, 0)),   # weights: resident
        pl.BlockSpec((cout, 1), lambda j: (0, 0)),      # bias: resident
    ]
    if residual is not None:
        assert residual.shape == (n, cout, ho, wo), "residual shape mismatch"
        rm = residual.transpose(1, 0, 2, 3).reshape(cout, nmat).astype(jnp.float32)
        if npad != nmat:
            rm = jnp.pad(rm, ((0, 0), (0, npad - nmat)))
        inputs.append(rm)
        in_specs.append(pl.BlockSpec((cout, tn), lambda j: (0, j)))

    kernel = functools.partial(_fused_conv_kernel, leaky=leaky, gain=float(gain),
                               has_residual=residual is not None)
    out = pl.pallas_call(
        kernel,
        out_shape=jax.ShapeDtypeStruct((cout, npad), jnp.float32),
        grid=(npad // tn,),
        in_specs=in_specs,
        out_specs=pl.BlockSpec((cout, tn), lambda j: (0, j)),
        compiler_params=pltpu.CompilerParams(
            # Independent lane tiles -> megacore sharding on v7x.
            dimension_semantics=("parallel",),
        ),
    )(*inputs)

    out = out[:, :nmat].reshape(cout, n, ho, wo).transpose(1, 0, 2, 3)
    return out


# ----------------------------------------------------------------------------
# Weight preprocessing (glue): fold the [1,3,3,1] low-pass filter into the weights.
# ----------------------------------------------------------------------------
def _setup_filter(taps=(1.0, 3.0, 3.0, 1.0)):
    f = np.asarray(taps, dtype=np.float32)
    f2 = np.outer(f, f)
    f2 = f2 / f2.sum()
    return jnp.asarray(f2)


def _compose_with_blur(w, f2):
    """K[m] = sum_{j+k=m} w[j] * f[k]  -> blur-then-conv == one conv with kernel K."""
    cout, cin, kh, kw = w.shape
    fh, fw = f2.shape
    k = jnp.zeros((cout, cin, kh + fh - 1, kw + fw - 1), w.dtype)
    for jy in range(kh):
        for jx in range(kw):
            k = k.at[:, :, jy:jy + fh, jx:jx + fw].add(w[:, :, jy:jy + 1, jx:jx + 1] * f2)
    return k


# ----------------------------------------------------------------------------
# DiscriminatorBlock forward (Pallas path)
# ----------------------------------------------------------------------------
def discriminator_block_forward(x, img, params, f2, *, in_channels,
                                img_channels, tmp_channels, out_channels):
    sqrt2 = float(np.sqrt(2.0))
    g = float(np.sqrt(0.5))

    if in_channels == 0:
        wg = 1.0 / np.sqrt(img_channels * 1.0)               # 1x1 kernel
        y0 = conv_bias_act(img, params["fromrgb_w"] * wg, params["fromrgb_b"],
                           stride=1, pad=0, leaky=True, gain=sqrt2)
        x = x + y0 if x is not None else y0

    # skip: 1x1 conv, down=2 with blur -> composed 4x4 kernel, stride 2, pad 1,
    # no bias, linear activation, gain sqrt(0.5).
    w_skip = params["skip_w"] * (1.0 / np.sqrt(tmp_channels * 1.0))
    k_skip = _compose_with_blur(w_skip, f2)
    y = conv_bias_act(x, k_skip, None, stride=2, pad=1, leaky=False, gain=g)

    # conv0: 3x3, pad 1, lrelu * sqrt(2).
    w0 = params["conv0_w"] * (1.0 / np.sqrt(tmp_channels * 9.0))
    x = conv_bias_act(x, w0, params["conv0_b"], stride=1, pad=1, leaky=True, gain=sqrt2)

    # conv1: 3x3 down=2 with blur -> composed 6x6 kernel, stride 2, pad 2,
    # lrelu, act gain sqrt(2)*sqrt(0.5) = 1; skip-branch add fused into the kernel.
    w1 = params["conv1_w"] * (1.0 / np.sqrt(tmp_channels * 9.0))
    k1 = _compose_with_blur(w1, f2)
    out = conv_bias_act(x, k1, params["conv1_b"], stride=2, pad=2,
                        leaky=True, gain=1.0, residual=y)
    return out


# ----------------------------------------------------------------------------
# Pure-JAX reference (mirrors the PyTorch ops: blur as a depthwise conv, then conv)
# ----------------------------------------------------------------------------
def _lrelu(v):
    return jnp.where(v >= 0.0, v, 0.2 * v)


def _conv2d_ref(x, w, *, stride, pad):
    return lax.conv_general_dilated(
        x, w, window_strides=(stride, stride),
        padding=((pad, pad), (pad, pad)),
        dimension_numbers=("NCHW", "OIHW", "NCHW"),
        precision=lax.Precision.HIGHEST)


def _blur_ref(x, f2, *, pad, down):
    c = x.shape[1]
    k = jnp.broadcast_to(f2[None, None, :, :], (c, 1, f2.shape[0], f2.shape[1]))
    return lax.conv_general_dilated(
        x, k, window_strides=(down, down),
        padding=((pad, pad), (pad, pad)),
        dimension_numbers=("NCHW", "OIHW", "NCHW"),
        feature_group_count=c,
        precision=lax.Precision.HIGHEST)


def discriminator_block_ref(x, img, params, f2, *, in_channels,
                            img_channels, tmp_channels, out_channels):
    sqrt2 = np.sqrt(2.0)
    g = np.sqrt(0.5)

    if in_channels == 0:
        w = params["fromrgb_w"] * (1.0 / np.sqrt(img_channels))
        y0 = _conv2d_ref(img, w, stride=1, pad=0) + params["fromrgb_b"][None, :, None, None]
        y0 = _lrelu(y0) * sqrt2
        x = x + y0 if x is not None else y0

    # skip: upfirdn2d(f, down=2, padding=1) then 1x1 conv, linear gain sqrt(0.5)
    xs = _blur_ref(x, f2, pad=1, down=2)
    y = _conv2d_ref(xs, params["skip_w"] * (1.0 / np.sqrt(tmp_channels)), stride=1, pad=0) * g

    # conv0
    h = _conv2d_ref(x, params["conv0_w"] * (1.0 / np.sqrt(tmp_channels * 9.0)), stride=1, pad=1)
    h = _lrelu(h + params["conv0_b"][None, :, None, None]) * sqrt2

    # conv1: upfirdn2d(f, padding=2) then 3x3 stride-2 conv, act gain 1
    hb = _blur_ref(h, f2, pad=2, down=1)
    h = _conv2d_ref(hb, params["conv1_w"] * (1.0 / np.sqrt(tmp_channels * 9.0)), stride=2, pad=0)
    h = _lrelu(h + params["conv1_b"][None, :, None, None])
    return y + h


# ----------------------------------------------------------------------------
if __name__ == "__main__":
    # Small config: first block (in_channels = 0) of a discriminator.
    N, img_channels, resolution = 2, 3, 16
    tmp_channels, out_channels = 32, 64

    key = jax.random.PRNGKey(0)
    ks = jax.random.split(key, 8)
    params = {
        "fromrgb_w": jax.random.normal(ks[0], (tmp_channels, img_channels, 1, 1), jnp.float32),
        "fromrgb_b": 0.1 * jax.random.normal(ks[1], (tmp_channels,), jnp.float32),
        "conv0_w":   jax.random.normal(ks[2], (tmp_channels, tmp_channels, 3, 3), jnp.float32),
        "conv0_b":   0.1 * jax.random.normal(ks[3], (tmp_channels,), jnp.float32),
        "conv1_w":   jax.random.normal(ks[4], (out_channels, tmp_channels, 3, 3), jnp.float32),
        "conv1_b":   0.1 * jax.random.normal(ks[5], (out_channels,), jnp.float32),
        "skip_w":    jax.random.normal(ks[6], (out_channels, tmp_channels, 1, 1), jnp.float32),
    }
    img = jax.random.normal(ks[7], (N, img_channels, resolution, resolution), jnp.float32)

    assert resolution % 2 == 0, "down=2 requires an even resolution"
    f2 = _setup_filter()

    out = discriminator_block_forward(
        None, img, params, f2,
        in_channels=0, img_channels=img_channels,
        tmp_channels=tmp_channels, out_channels=out_channels)
    out = jax.block_until_ready(out)

    ref = discriminator_block_ref(
        None, img, params, f2,
        in_channels=0, img_channels=img_channels,
        tmp_channels=tmp_channels, out_channels=out_channels)

    assert out.shape == (N, out_channels, resolution // 2, resolution // 2), out.shape
    err = float(jnp.max(jnp.abs(out - ref)))
    assert err < 1e-3, f"mismatch vs reference: max abs err = {err}"

    print("KERNEL_OK")
</pallas_src>

<mosaic_0001>
module attributes {stable_mosaic.version = 11 : i64} {
  func.func @_fused_conv_kernel(%arg0: i32, %arg1: memref<3x256xf32, #tpu.memory_space<vmem>>, %arg2: memref<32x3xf32, #tpu.memory_space<vmem>>, %arg3: memref<32x1xf32, #tpu.memory_space<vmem>>, %arg4: memref<32x256xf32, #tpu.memory_space<vmem>>) attributes {dimension_semantics = [#tpu.dimension_semantics<parallel>], iteration_bounds = array<i64: 2>, scalar_prefetch = 0 : i64, scratch_operands = 0 : i64, tpu.core_type = #tpu.core_type<tc>, window_params = [{transform_indices = @transform_0, window_bounds = array<i64: 3, 256>}, {pipeline_mode = #tpu.pipeline_mode<synchronous>, transform_indices = @transform_1, window_bounds = array<i64: 32, 3>}, {pipeline_mode = #tpu.pipeline_mode<synchronous>, transform_indices = @transform_2, window_bounds = array<i64: 32, 1>}, {transform_indices = @transform_3, window_bounds = array<i64: 32, 256>}]} {
    %c0 = arith.constant 0 : index
    %c0_0 = arith.constant 0 : index
    %0 = vector.load %arg2[%c0, %c0_0] : memref<32x3xf32, #tpu.memory_space<vmem>>, vector<32x3xf32>
    %c0_1 = arith.constant 0 : index
    %c0_2 = arith.constant 0 : index
    %1 = vector.load %arg1[%c0_1, %c0_2] : memref<3x256xf32, #tpu.memory_space<vmem>>, vector<3x256xf32>
    %cst = arith.constant dense<0.000000e+00> : vector<32x256xf32>
    %2 = tpu.matmul %0, %1, %cst {dimension_numbers = #tpu.dot_dimension_numbers<[1], [0], [0], [1], [0, 0, 1, 1], [], []>} : vector<32x3xf32>, vector<3x256xf32>, vector<32x256xf32> -> vector<32x256xf32>
    %c0_3 = arith.constant 0 : index
    %c0_4 = arith.constant 0 : index
    %3 = vector.load %arg3[%c0_3, %c0_4] : memref<32x1xf32, #tpu.memory_space<vmem>>, vector<32x1xf32>
    %4 = vector.broadcast %3 : vector<32x1xf32> to vector<32x256xf32>
    %5 = arith.addf %2, %4 : vector<32x256xf32>
    %cst_5 = arith.constant 0.000000e+00 : f32
    %6 = vector.broadcast %cst_5 : f32 to vector<32x256xf32>
    %7 = arith.cmpf oge, %5, %6 : vector<32x256xf32>
    %cst_6 = arith.constant 2.000000e-01 : f32
    %8 = vector.broadcast %cst_6 : f32 to vector<32x256xf32>
    %9 = arith.mulf %8, %5 : vector<32x256xf32>
    %10 = arith.select %7, %5, %9 : vector<32x256xi1>, vector<32x256xf32>
    %cst_7 = arith.constant 1.41421354 : f32
    %11 = vector.broadcast %cst_7 : f32 to vector<32x256xf32>
    %12 = arith.mulf %10, %11 : vector<32x256xf32>
    %c0_8 = arith.constant 0 : index
    %c0_9 = arith.constant 0 : index
    %13 = vector.load %arg4[%c0_8, %c0_9] : memref<32x256xf32, #tpu.memory_space<vmem>>, vector<32x256xf32>
    tpu.vector_store %arg4[%c0_8, %c0_9], %12 {strides = array<i32>} : memref<32x256xf32, #tpu.memory_space<vmem>>, vector<32x256xf32>,
    return
  }
  func.func @transform_0(%arg0: i32) -> (i32, i32) {
    %c0_i32 = arith.constant 0 : i32
    %c0_i32_0 = arith.constant 0 : i32
    return %c0_i32, %arg0 : i32, i32
  }
  func.func @transform_1(%arg0: i32) -> (i32, i32) {
    %c0_i32 = arith.constant 0 : i32
    %c0_i32_0 = arith.constant 0 : i32
    %c0_i32_1 = arith.constant 0 : i32
    return %c0_i32, %c0_i32_0 : i32, i32
  }
  func.func @transform_2(%arg0: i32) -> (i32, i32) {
    %c0_i32 = arith.constant 0 : i32
    %c0_i32_0 = arith.constant 0 : i32
    %c0_i32_1 = arith.constant 0 : i32
    return %c0_i32, %c0_i32_0 : i32, i32
  }
  func.func @transform_3(%arg0: i32) -> (i32, i32) {
    %c0_i32 = arith.constant 0 : i32
    %c0_i32_0 = arith.constant 0 : i32
    return %c0_i32, %arg0 : i32, i32
  }
}

</mosaic_0001>

<bundles_post_ra>
// kernel: tpu_custom_call.1
= control target key start
LH: loop header
LB: loop body
LE: loop exit
PB: predicated region body
PF: predicated region fallthrough
CT: control target
= control target key end

     0   :  { %8 = vsyncpa [#allocation3], 0  ;;  %s722_s0 = inlined_call_operand.vmem [shape: f32[3,512], index: 0, kind: input, shape index: {}]   ;;  %s723_s1 = inlined_call_operand.vmem [shape: f32[32,3], index: 1, kind: input, shape index: {}]   ;;  %s724_s2 = inlined_call_operand.vmem [shape: f32[32,1], index: 2, kind: input, shape index: {}]   ;;  %s725_s3 = inlined_call_operand.hbm [shape: f32[32,512], index: 3, kind: output, shape index: {}]  }
   0x1   :  { %10 = vsyncpa [#allocation3 + $0x1], 0  ;;  %s582_s12 = smov 0   ;;  %s584_s13 = smov 0  }
   0x2   :  { %s586_s14 = smov 0   ;;  %s588_s15 = smov 0  }
   0x3 LB: > { %s603_s16 = sadd.s32 4294967295, %s554_s15   ;;  %s426_s17 = sadd.s32 4294967294, %s554_s15   ;;  %s554_s15 = sphi %s588_s15, %s731_s15   ;;  %s550_s14 = sphi %s586_s14, %s730_s14   ;;  %s546_s13 = sphi %s584_s13, %s729_s13   ;;  %s542_s12 = sphi %s582_s12, %s728_s12  }
   0x4   : > { %s607_s18 = sadd.s32 1, %s554_s15   ;;  %s91_s19 = sadd.s32 1, %s550_s14 }
   0x5   : > { %s88_s20 = ssub.s32 %s554_s15, %s607_s18  ;;  %p101_p0 = scmp.ne.s32.totalorder %s550_s14, %s546_s13 }
   0x6   : > { %p89_p1 = scmp.eq.s32.totalorder %s88_s20, 0  ;;  %p102_p2 = scmp.eq.s32.totalorder %s603_s16, 1 }
   0x7   : > { %p107_p3 = scmp.ne.s32.totalorder %s546_s13, %s542_s12  ;;  %p108_p4 = scmp.eq.s32.totalorder %s426_s17, 1 }
   0x8   : > { %s618_s21 = scalar_select %p89_p1, %s550_s14, %s91_s19  }
   0x9   : > { %p620_p5 = por %p102_p2, %p101_p0  ;;  %p624_p6 = por %p108_p4, %p107_p3 }
   0xa   : > { %p429_p7 = scmp.ge.s32.totalorder %s554_s15, 1  ;;  %p141_p8 = scmp.lt.s32.totalorder %s554_s15, 3 }
   0xc   : > { %p142_p9 = pnand %p429_p7, %p141_p8 }
   0xd   : > { %s431_s24 = sshll.u32 (!%p142_p9), %s603_s16, 1  ;;  %s162_s27 = sand.u32 (!%p142_p9), 1, %s546_s13  }
   0xe   : > { %145 = sbr.rel (%p142_p9) target bundleno = 252 (0xfc), region = 32  ;;  %p166_p10 = scmp.lt.s32.totalorder (!%p142_p9), %s431_s24, 3 }
   0xf   : > { %s430_s28 = sshll.u32 (!%p142_p9), %s162_s27, 6  ;;  %s444_s4 = sshll.u32 (!%p142_p9), %s603_s16, 8 }
  0x10   : > { %s661_s29 = scalar_lea.vmem (!%p142_p9), [#allocation2], %s430_s28  ;;  %s682_s7 = scalar_lea.sflag (!%p142_p9), [#allocation3], %s162_s27 }
  0x11   : > { %s364_s30 = sshll.u32 (!%p142_p9), %s661_s29, 4  ;;  %s669_s30 = int_to_ptr.vmem [resolvable:$true] %s364_s30 }
  0x12   : > { %s494_s8 = scalar_lea.vmem (!%p142_p9), %s669_s30, 1024 }
  0x13   : > { %v556_v0 = vmov 0.0   ;;  %v179_v1 = vld [vmem:[%s724_s2 + $0x10] sm:$0xff]  ;;  %v557_v2 = vmov 0   ;;  %v177_v3 = vld [vmem:[%s724_s2] sm:$0xff]  ;;  %s733_s24 = smov (!%p166_p10, %s431_s24), 3  ;;  %v180_v4 = vld [vmem:[%s724_s2 + $0x18] sm:$0xff]  ;;  %p495_p11 = scmp.ne.s32.totalorder %s669_s30, %s494_s8 }
  0x14   : > { %285 = vmatprep.mubr.f32.mxu0 %v556_v0  ;;  %297 = vmatprep.mubr.f32.mxu1 %v556_v0  ;;  %v178_v5 = vld [vmem:[%s724_s2 + $0x8] sm:$0xff]  ;;  %s432_s6 = sshll.u32 %s733_s24, 2  ;;  %vm216_vm0 = vcmask 1042432   ;;  %v172_v8 = vld [vmem:[%s723_s1] sm:$0xff]  ;;  %vm203_vm1 = vcmask 23552   ;;  %v174_v9 = vld [vmem:[%s723_s1 + $0x10] sm:$0xff] }
  0x15   : > { %492 = vset.pattern.permute.xlu1 %v557_v2  ;;  %491 = vset.pattern.permute.xlu0 %v557_v2  ;;  %s169_s9 = scalar_lea.vmem %s722_s0, %s432_s6  ;;  %v173_v10 = vld [vmem:[%s723_s1 + $0x8] sm:$0xff]  ;;  %v175_v11 = vld [vmem:[%s723_s1 + $0x18] sm:$0xff]  ;;  %s676_s6 = scalar_lea.hbm %s725_s3, %s444_s4 }
  0x16   : > { %193 = vperm.xlu1 %492, %v179_v1   ;;  %183 = vperm.xlu0 %491, %v177_v3   ;;  %v176_v6 = vld [vmem:[%s169_s9] sm:$0x77]  ;;  %p496_p12 = pnand %p495_p11, %p620_p5  ;;  %s558_s9 = smov [#allocation2]  }
  0x17   : > { %v202_v7 = vcombine.high %v176_v6, %v176_v6  ;;  %s498_s10 = sshll.u32 %s558_s9, 4  ;;  %s499_s10 = int_to_ptr.vmem [resolvable:$false] %s498_s10 }
  0x18   : > { %p497_p13 = pneg %p496_p12  ;;  %s500_s11 = scalar_lea.vmem %s499_s10, 2048 }
  0x19   : > { %433 = vmatprep.subr.msk.mxu0 %vm216_vm0, %v202_v7  ;;  %445 = vmatprep.subr.msk.mxu1 %vm216_vm0, %v202_v7  ;;  %p501_p0 = scmp.lt.s32.totalorder %s669_s30, %s499_s10  ;;  %p502_p1 = scmp.lt.s32.totalorder %s500_s11, %s494_s8 }
  0x1a   : > { %198 = vperm.xlu1 %492, %v180_v4   ;;  %188 = vperm.xlu0 %491, %v178_v5  }
  0x1b   : > { %434 = vmatpush1.msk.msra.mxu0 %vm216_vm0, %v176_v6  ;;  %446 = vmatpush1.msk.msra.mxu1 %vm216_vm0, %v176_v6  ;;  %p503_p2 = por %p502_p1, %p501_p0 }
  0x1c   : > { %435 = vmatmul.mubr.msk.f32.vlgmr.msra.gmra.mxu0 %vm203_vm1, %v172_v8  ;;  %437 = vmatmul.mubr.msk.f32.vlgmr.msra.gmra.mxu1 %vm203_vm1, %v174_v9 }
  0x1d   : > { %291 = vmatprep.mubr.f32.mxu0 %v556_v0  ;;  %303 = vmatprep.mubr.f32.mxu1 %v556_v0  ;;  %p504_p3 = pnand %p503_p2, %p497_p13 }
  0x20   : > { %436 = vmatmul.mubr.msk.f32.gmra.mxu0 %vm203_vm1, %v173_v10  ;;  %438 = vmatmul.mubr.msk.f32.gmra.mxu1 %vm203_vm1, %v175_v11 }
  0x91   : > { %v194_v12 = vpop.permute.xlu1 %193  ;;  %v184_v13 = vpop.permute.xlu0 %183 }
  0x95   : > { %v199_v22 = vpop.permute.xlu1 %198  ;;  %v189_v23 = vpop.permute.xlu0 %188 }
  0xdc   : > { %v287_v14 = vpop.f32.mrf.mxu0  ;;  %v299_v15 = vpop.f32.mrf.mxu1 }
  0xdd   : > { %v288_v16 = vadd.f32 %v287_v14, %v184_v13  ;;  %v300_v17 = vadd.f32 %v299_v15, %v194_v12 }
  0xde   : > { %v289_v18 = vpop.f32.mrf.mxu0  ;;  %v301_v19 = vpop.f32.mrf.mxu1 }
  0xdf   : > { %vm310_vm2 = vcmp.ge.f32.partialorder %v288_v16, 0.0  ;;  %v318_v20 = vmul.f32 0.2, %v288_v16  ;;  %vm314_vm3 = vcmp.ge.f32.partialorder %v300_v17, 0.0  ;;  %v322_v21 = vmul.f32 0.2, %v300_v17 }
  0xe0   : > { %v290_v24 = vadd.f32 %v289_v18, %v184_v13  ;;  %v302_v25 = vadd.f32 %v301_v19, %v194_v12  ;;  %v293_v26 = vpop.f32.mrf.mxu0  ;;  %v305_v27 = vpop.f32.mrf.mxu1 }
  0xe1   : > { %v326_v28 = vsel %vm310_vm2, %v288_v16, %v318_v20  ;;  %v330_v29 = vsel %vm314_vm3, %v300_v17, %v322_v21  ;;  %v294_v30 = vadd.f32 %v293_v26, %v189_v23  ;;  %v306_v31 = vadd.f32 %v305_v27, %v199_v22 }
  0xe2   : > { %v334_v32 = vmul.f32 1.4142135, %v326_v28  ;;  %v338_v33 = vmul.f32 1.4142135, %v330_v29  ;;  %vm311_vm4 = vcmp.ge.f32.partialorder %v290_v24, 0.0  ;;  %vm315_vm5 = vcmp.ge.f32.partialorder %v302_v25, 0.0  ;;  %v295_v34 = vpop.f32.mrf.mxu0  ;;  %v307_v35 = vpop.f32.mrf.mxu1 }
  0xe3   : > { %v319_v36 = vmul.f32 0.2, %v290_v24  ;;  %v323_v37 = vmul.f32 0.2, %v302_v25  ;;  %vm312_vm6 = vcmp.ge.f32.partialorder %v294_v30, 0.0  ;;  %vm316_vm7 = vcmp.ge.f32.partialorder %v306_v31, 0.0 }
  0xe4   : > { %342 = vst [vmem:[%s661_s29] sm:$0xff] %v334_v32  ;;  %346 = vst [vmem:[%s661_s29 + $0x20] sm:$0xff] %v338_v33  ;;  %v320_v38 = vmul.f32 0.2, %v294_v30  ;;  %v324_v39 = vmul.f32 0.2, %v306_v31  ;;  %v296_v40 = vadd.f32 %v295_v34, %v189_v23  ;;  %v308_v41 = vadd.f32 %v307_v35, %v199_v22 }
  0xe5   : > { %v327_v42 = vsel %vm311_vm4, %v290_v24, %v319_v36  ;;  %v331_v43 = vsel %vm315_vm5, %v302_v25, %v323_v37 }
  0xe6   : > { %v335_v44 = vmul.f32 1.4142135, %v327_v42  ;;  %v339_v45 = vmul.f32 1.4142135, %v331_v43  ;;  %v328_v46 = vsel %vm312_vm6, %v294_v30, %v320_v38  ;;  %v332_v47 = vsel %vm316_vm7, %v306_v31, %v324_v39 }
  0xe7   : > { %v336_v48 = vmul.f32 1.4142135, %v328_v46  ;;  %v340_v49 = vmul.f32 1.4142135, %v332_v47  ;;  %vm313_vm8 = vcmp.ge.f32.partialorder %v296_v40, 0.0  ;;  %vm317_vm9 = vcmp.ge.f32.partialorder %v308_v41, 0.0 }
  0xe8   : > { %343 = vst [vmem:[%s661_s29 + $0x8] sm:$0xff] %v335_v44  ;;  %347 = vst [vmem:[%s661_s29 + $0x28] sm:$0xff] %v339_v45  ;;  %v321_v50 = vmul.f32 0.2, %v296_v40  ;;  %v325_v51 = vmul.f32 0.2, %v308_v41 }
  0xe9   : > { %344 = vst [vmem:[%s661_s29 + $0x10] sm:$0xff] %v336_v48  ;;  %348 = vst [vmem:[%s661_s29 + $0x30] sm:$0xff] %v340_v49 }
  0xea   : > { %v329_v52 = vsel %vm313_vm8, %v296_v40, %v321_v50  ;;  %v333_v53 = vsel %vm317_vm9, %v308_v41, %v325_v51 }
  0xeb   : > { %v337_v54 = vmul.f32 1.4142135, %v329_v52  ;;  %v341_v55 = vmul.f32 1.4142135, %v333_v53 }
  0xed   : > { %345 = vst [vmem:[%s661_s29 + $0x18] sm:$0xff] %v337_v54  ;;  %349 = vst [vmem:[%s661_s29 + $0x38] sm:$0xff] %v341_v55 }
  0xee   : > { %507 = shalt.err (!%p504_p3)
}
  0xef   : > { %s508_s17 = scalar_lea.hbm %s676_s6, 1024  ;;  %s512_s24 = scalar_lea.hbm %s725_s3, 2048 }
  0xf0   : > { %p509_p4 = scmp.ne.s32.totalorder %s676_s6, %s508_s17  ;;  %p513_p9 = scmp.lt.s32.totalorder %s676_s6, %s725_s3 }
  0xf1   : > { %p514_p10 = scmp.lt.s32.totalorder %s512_s24, %s508_s17 }
  0xf2   : > { %p510_p7 = pnand %p509_p4, %p620_p5 }
  0xf3   : > { %p515_p11 = por %p514_p10, %p513_p9 }
  0xf4   : > { %p511_p8 = pneg %p510_p7 }
  0xf6   : > { %p516_p12 = pnand %p515_p11, %p511_p8 }
  0xf8   : > { %519 = shalt.err (!%p516_p12)
}
  0xf9   : > { %s559_s27 = smov 256   ;;  %s560_s28 = smov 512  }
  0xfa   : > { %s561_s29 = smov 16  }
  0xfb   : > { %447 = dma.vmem_to_hbm [thread:$0]  (%p620_p5), %s669_s30, 1024, %s676_s6, %s682_s7, %s559_s27, %s560_s28, %s561_s29  }
  0xfc PF: > { %p453_p13 = scmp.ge.s32.totalorder %s554_s15, 2  ;;  %s379_s4 = sand.u32 1, %s542_s12  }
  0xfd   : > { %s380_s16 = scalar_lea.sflag [#allocation3], %s379_s4 }
  0xfe   : > { %p450_p0 = pnand %p453_p13, %p624_p6 }
 0x100   : > { %p451_p1 = pneg %p450_p0 }
 0x102   : > { %537 = dma.done.wait (%p451_p1), %s380_s16, 1024  }
 0x103   : > { %539 = vsyncadd (%p451_p1), %s380_s16, 4294966272  ;;  %p13_p2 = scmp.ge.s32.totalorder %s607_s18, 4   ;;  %s728_s12 = smov %s546_s13 }
 0x104   : > { %s729_s13 = smov %s550_s14  ;;  %s730_s14 = smov %s618_s21 }
 0x105   : > { %s731_s15 = smov %s607_s18  ;;  %15 = sbr.rel (!%p13_p2) target bundleno = 3 (0x3), region = 67 }
 0x10a   :  { %385 = vsyncpa [#allocation3], 1 }
 0x10b   :  { %387 = vsyncpa [#allocation3 + $0x1], 1 }

</bundles_post_ra>
